<compile_context>
chip_gen: v7x
topology: tpu7x:2x2x1
jax: 0.10.0
libtpu: 0.0.40
codegen_flags: <defaults>
</compile_context>

<pallas_src>
import functools
import math

import jax
import jax.numpy as jnp
from jax.experimental import pallas as pl
from jax.experimental.pallas import tpu as pltpu


_INV_SQRT2 = 0.7071067811865476


# ---------------------------------------------------------------------------
# generation-aware VMEM sizing helpers
# ---------------------------------------------------------------------------

def _vmem_capacity_bytes():
    try:
        return int(pltpu.get_tpu_info().vmem_capacity_bytes)
    except Exception:
        return 64 * 1024 * 1024  # conservative (v7x per-TC VMEM)


def _vmem_limit_bytes():
    cap = _vmem_capacity_bytes()
    return int(min(cap * 3 // 4, 96 * 1024 * 1024))


def _vmem_budget_bytes():
    # budget for the double-buffered streamed operand of one kernel
    return int(min(_vmem_capacity_bytes() // 4, 24 * 1024 * 1024))


# ---------------------------------------------------------------------------
# KernelAttention: avg-pool -> 1x1 conv -> GELU -> 1x1 conv -> sigmoid
# ---------------------------------------------------------------------------

def _attention_kernel(x_ref, w1_ref, b1_ref, w2_ref, b2_ref, o_ref, acc_ref,
                      *, thw, inv_hw):
    # x_ref : (TB, C, THW)   w1_ref : (C, mid)   b1_ref : (1, mid)
    # w2_ref: (mid, K)       b2_ref : (1, K)     o_ref  : (TB, K)
    # acc_ref (VMEM scratch): (TB, C, 128) running lane-chunk sums
    s = pl.program_id(1)
    n_s = pl.num_programs(1)

    @pl.when(s == 0)
    def _():
        acc_ref[...] = jnp.zeros_like(acc_ref)

    # steady state: pure VPU adds of 128-lane chunks (no per-step XLU reduce)
    n_full = thw // 128
    rem = thw - n_full * 128
    for j in range(n_full):
        acc_ref[...] += x_ref[:, :, j * 128:(j + 1) * 128]
    if rem:
        acc_ref[:, :, :rem] += x_ref[:, :, n_full * 128:]

    @pl.when(s == n_s - 1)
    def _():
        # single cross-lane reduce, then the tiny MLP epilogue
        pooled = jnp.sum(acc_ref[...], axis=-1) * inv_hw                 # (TB, C)
        h = jnp.dot(pooled, w1_ref[...], preferred_element_type=jnp.float32)
        h = h + b1_ref[...]
        # exact (erf-based) GELU, matching torch.nn.GELU()
        h = 0.5 * h * (1.0 + jax.lax.erf(h * _INV_SQRT2))
        y = jnp.dot(h, w2_ref[...], preferred_element_type=jnp.float32)
        y = y + b2_ref[...]
        o_ref[...] = jax.nn.sigmoid(y)


def _choose_spatial_tile(hw, tb, c, budget_bytes, max_elems=None):
    """Largest lane-aligned spatial tile dividing HW within the VMEM budget."""
    if hw % 128 != 0:
        return hw  # full spatial axis in one block (always legal)
    cap = (budget_bytes // 4) // (2 * tb * c)        # f32, double-buffered window
    cap = min(cap, max_elems if max_elems is not None else 2048)
    cap = max(128, (cap // 128) * 128)
    if hw <= cap:
        return hw
    # prefer multiples of 256 (fills the 256-wide MXU / store path on v6e/v7x)
    for step in (256, 128):
        best = 0
        t = step
        while t <= cap:
            if hw % t == 0:
                best = t
            t += step
        if best:
            return best
    return 128


def kernel_attention(x_nchw, w1, b1, w2, b2, *, max_spatial_tile=None):
    """x_nchw: (B, C, H, W) f32 -> attention (B, K) f32."""
    B, C, H, W = x_nchw.shape
    HW = H * W
    mid = w1.shape[1]
    K = w2.shape[1]
    x_flat = x_nchw.reshape(B, C, HW).astype(jnp.float32)

    # Keep the output block sublane-aligned: TB=8 when possible, else full B.
    # (For B >= 16 this also leaves >=2 programs on the parallel axis for v7x.)
    TB = 8 if B % 8 == 0 else B
    THW = _choose_spatial_tile(HW, TB, C, _vmem_budget_bytes(),
                               max_elems=max_spatial_tile)
    grid = (B // TB, HW // THW)

    kernel = functools.partial(_attention_kernel, thw=THW, inv_hw=float(1.0 / HW))
    return pl.pallas_call(
        kernel,
        out_shape=jax.ShapeDtypeStruct((B, K), jnp.float32),
        grid_spec=pltpu.PrefetchScalarGridSpec(
            num_scalar_prefetch=0,
            grid=grid,
            in_specs=[
                # streamed activation tiles
                pl.BlockSpec((TB, C, THW), lambda b, s: (b, 0, s)),
                # weights/biases: constant block index -> resident in VMEM
                pl.BlockSpec((C, mid), lambda b, s: (0, 0)),
                pl.BlockSpec((1, mid), lambda b, s: (0, 0)),
                pl.BlockSpec((mid, K), lambda b, s: (0, 0)),
                pl.BlockSpec((1, K), lambda b, s: (0, 0)),
            ],
            out_specs=pl.BlockSpec((TB, K), lambda b, s: (b, 0)),
            scratch_shapes=[pltpu.VMEM((TB, C, 128), jnp.float32)],
        ),
        compiler_params=pltpu.CompilerParams(
            dimension_semantics=("parallel", "arbitrary"),
            vmem_limit_bytes=_vmem_limit_bytes()),
    )(x_flat, w1, b1, w2, b2)


# ---------------------------------------------------------------------------
# KernelAggregation: per-sample dynamic conv with attention-mixed kernels
# ---------------------------------------------------------------------------

def _aggregation_kernel(att_ref, x_ref, h_ref, w_ref, bm_ref, o_ref,
                        win_ref, xm_ref, wmix_ref,
                        *, tap_offsets, num_kernels, c_in, tq, halo2):
    # att_ref (SMEM): (B, K) sigmoid attention weights
    # x_ref : (1, C_in, TQ)        main padded-flat tile for this (sample, tile)
    # h_ref : (1, 1, C_in, halo2)  halo strip (the next 2*halo positions)
    # w_ref : (K, C_out, T*C_in)   candidate kernels, merged-tap layout (resident)
    # bm_ref: (1, C_out, 1)        per-sample mixed bias (precomputed in wrapper)
    # o_ref : (1, C_out, TQ)       padded-flat output tile
    # scratch: win (C_in, TQ+halo2), xm (T*C_in, TQ), wmix (C_out, T*C_in)
    b = pl.program_id(0)
    s = pl.program_id(1)

    # --- mix the K candidate kernels ONCE per sample (tiny VPU work) ---------
    @pl.when(s == 0)
    def _():
        wm = att_ref[b, 0] * w_ref[0]
        for k in range(1, num_kernels):
            wm = wm + att_ref[b, k] * w_ref[k]
        wmix_ref[...] = wm.astype(wmix_ref.dtype)

    # --- assemble the halo window covering [q0, q0 + TQ + 2*halo) ------------
    win_ref[:, :tq] = x_ref[0]
    if halo2:
        win_ref[:, tq:] = h_ref[0, 0]

    # --- gather the ks*ks taps into one merged contraction operand -----------
    for t, off in enumerate(tap_offsets):
        xm_ref[t * c_in:(t + 1) * c_in, :] = win_ref[:, off:off + tq]

    # --- single MXU matmul: (C_out, T*C_in) @ (T*C_in, TQ), f32 accumulate ---
    acc = jnp.dot(wmix_ref[...], xm_ref[...], preferred_element_type=jnp.float32)
    o_ref[0] = (acc + bm_ref[0]).astype(o_ref.dtype)


def _choose_agg_tile(c_in, taps, xbytes, budget_bytes, max_tile=4096):
    # per output position: 2x streamed x block + halo window + merged taps
    # (all xbytes wide) + double-buffered f32 output block.
    per_elem = c_in * (taps + 3) * xbytes + 2 * c_in * 4
    tq = budget_bytes // max(per_elem, 1)
    tq = (tq // 256) * 256
    return max(256, min(max_tile, tq))


def kernel_aggregation(x_nchw, attention, weight, bias, *, kernel_size, groups=1,
                       compute_dtype=jnp.float32, hw_tile=None):
    """x: (B,C,H,W), attention: (B,K), weight: (K,C,C//g,ks,ks), bias: (K,C)."""
    # TODO(synk): only the default groups == 1 dynamic-conv path is implemented.
    assert groups == 1, "grouped dynamic conv (groups > 1) not implemented"
    B, C, H, W = x_nchw.shape
    K, c_out, c_in, kh, kw = weight.shape
    assert (c_out, c_in, kh, kw) == (C, C // groups, kernel_size, kernel_size)
    pad = kernel_size // 2
    Hp, Wp = H + 2 * pad, W + 2 * pad
    T = kh * kw
    TC = T * c_in
    halo = pad * Wp + pad
    halo2 = 2 * halo
    xbytes = jnp.dtype(compute_dtype).itemsize

    # --- pick the padded-flat spatial tile (multiples of 256) ----------------
    if hw_tile is None:
        TQ = _choose_agg_tile(c_in, T, xbytes, _vmem_budget_bytes())
        TQ = min(TQ, -(-(Hp * Wp) // 256) * 256)   # don't exceed the problem size
    else:
        TQ = int(hw_tile)
    assert TQ % 128 == 0, "aggregation spatial tile must be a multiple of 128"
    n_s = -(-(Hp * Wp) // TQ)
    Lout = n_s * TQ
    Lext = Lout + halo2

    # --- layout plumbing in the wrapper (no im2col, single pad/cast copy) ----
    # padded-flat input with front/back halos so every tap is a constant shift
    xpad = jnp.pad(x_nchw.astype(compute_dtype),
                   ((0, 0), (0, 0), (pad, pad), (pad, pad)))
    xflat = xpad.reshape(B, C, Hp * Wp)
    x_ext = jnp.pad(xflat, ((0, 0), (0, 0), (halo, Lout + halo - Hp * Wp)))
    # tiny per-tile halo strips (the 2*halo positions following each tile)
    if halo2 > 0:
        x_halo = jnp.stack(
            [x_ext[:, :, (s + 1) * TQ:(s + 1) * TQ + halo2] for s in range(n_s)],
            axis=1)                                              # (B, n_s, C, halo2)
        halo_dim = halo2
    else:
        x_halo = jnp.zeros((B, n_s, C, 1), compute_dtype)        # dummy, unused
        halo_dim = 1
    # candidate kernels in merged-tap layout; per-sample bias mixed here (tiny)
    w_merged = jnp.transpose(weight, (0, 1, 3, 4, 2)).reshape(K, c_out, TC)
    w_merged = w_merged.astype(jnp.float32)
    b_mix = jnp.dot(attention.astype(jnp.float32),
                    bias.astype(jnp.float32)).reshape(B, c_out, 1)
    tap_offsets = tuple(dy * Wp + dx for dy in range(kh) for dx in range(kw))

    kernel = functools.partial(_aggregation_kernel, tap_offsets=tap_offsets,
                               num_kernels=K, c_in=c_in, tq=TQ, halo2=halo2)
    out_flat = pl.pallas_call(
        kernel,
        out_shape=jax.ShapeDtypeStruct((B, c_out, Lout), jnp.float32),
        grid_spec=pltpu.PrefetchScalarGridSpec(
            num_scalar_prefetch=0,
            grid=(B, n_s),
            in_specs=[
                pl.BlockSpec(memory_space=pltpu.MemorySpace.SMEM),          # attention
                pl.BlockSpec((1, C, TQ), lambda b, s: (b, 0, s)),           # main tile
                pl.BlockSpec((1, 1, C, halo_dim), lambda b, s: (b, s, 0, 0)),  # halo strip
                pl.BlockSpec((K, c_out, TC), lambda b, s: (0, 0, 0)),       # kernels (resident)
                pl.BlockSpec((1, c_out, 1), lambda b, s: (b, 0, 0)),        # mixed bias
            ],
            out_specs=pl.BlockSpec((1, c_out, TQ), lambda b, s: (b, 0, s)),
            scratch_shapes=[
                pltpu.VMEM((C, TQ + halo2), compute_dtype),   # halo window
                pltpu.VMEM((TC, TQ), compute_dtype),          # merged taps
                pltpu.VMEM((c_out, TC), compute_dtype),       # per-sample mixed kernel
            ],
        ),
        compiler_params=pltpu.CompilerParams(
            dimension_semantics=("parallel", "arbitrary"),
            vmem_limit_bytes=_vmem_limit_bytes()),
    )(attention.astype(jnp.float32), x_ext, x_halo, w_merged, b_mix)

    # crop the valid window out of the padded-flat layout (layout plumbing)
    out = out_flat[:, :, :Hp * Wp].reshape(B, c_out, Hp, Wp)
    return out[:, :, pad:pad + H, pad:pad + W]


# ---------------------------------------------------------------------------
# DyConv forward (num_kernels > 1 path == DynamicKernelAggregation)
# ---------------------------------------------------------------------------

def dyconv_forward(x, params, *, kernel_size, groups=1, compute_dtype=jnp.float32,
                   attention_spatial_tile=None, agg_hw_tile=None):
    # TODO(synk): the num_kernels == 1 branch of DyConv (a plain static Conv2d)
    # is not covered here; this implements the dynamic (num_kernels > 1) path.
    att = kernel_attention(x, params["att_w1"], params["att_b1"],
                           params["att_w2"], params["att_b2"],
                           max_spatial_tile=attention_spatial_tile)
    return kernel_aggregation(x, att, params["agg_weight"], params["agg_bias"],
                              kernel_size=kernel_size, groups=groups,
                              compute_dtype=compute_dtype, hw_tile=agg_hw_tile)


# ---------------------------------------------------------------------------
# Pure-JAX reference (mirrors the PyTorch forward exactly)
# ---------------------------------------------------------------------------

def _dyconv_reference(x, params, *, kernel_size, groups=1):
    hi = jax.lax.Precision.HIGHEST
    pooled = jnp.mean(x, axis=(2, 3))
    h = jnp.dot(pooled, params["att_w1"], precision=hi) + params["att_b1"][0]
    h = 0.5 * h * (1.0 + jax.lax.erf(h / jnp.sqrt(2.0)))
    y = jnp.dot(h, params["att_w2"], precision=hi) + params["att_b2"][0]
    att = jax.nn.sigmoid(y)                                              # (B, K)

    weight = params["agg_weight"]                                        # (K, C, C//g, kh, kw)
    bias = params["agg_bias"]                                            # (K, C)
    B, C, H, W = x.shape
    _, _, c_in, kh, kw = weight.shape
    pad = kernel_size // 2
    w_mix = jnp.einsum("bk,koihw->boihw", att, weight, precision=hi)
    b_mix = jnp.dot(att, bias, precision=hi)

    # exactly the PyTorch trick: grouped conv with groups = B * groups
    o = jax.lax.conv_general_dilated(
        x.reshape(1, B * C, H, W),
        w_mix.reshape(B * C, c_in, kh, kw),
        window_strides=(1, 1),
        padding=[(pad, pad), (pad, pad)],
        dimension_numbers=("NCHW", "OIHW", "NCHW"),
        feature_group_count=B * groups,
        precision=hi)
    out = o.reshape(B, C, H, W) + b_mix[:, :, None, None]
    return att, out


if __name__ == "__main__":
    # DyConv(dim=32, kernel_size=3, groups=1, num_kernels=4)
    B, C, H, W = 2, 32, 16, 16
    kernel_size, groups, num_kernels = 3, 1, 4
    mid = C // 8  # KernelAttention default reduction=8

    key = jax.random.PRNGKey(0)
    keys = jax.random.split(key, 7)
    x = jax.random.normal(keys[0], (B, C, H, W), dtype=jnp.float32)

    # KernelAttention params (1x1 conv weights stored as (in, out) matrices)
    bound1 = 1.0 / math.sqrt(C)
    w1 = jax.random.uniform(keys[1], (C, mid), jnp.float32, -bound1, bound1)
    b1 = jax.random.uniform(keys[2], (1, mid), jnp.float32, -bound1, bound1)
    bound2 = 1.0 / math.sqrt(mid)
    w2 = jax.random.uniform(keys[3], (mid, num_kernels), jnp.float32, -bound2, bound2)
    b2 = jax.random.uniform(keys[4], (1, num_kernels), jnp.float32, -bound2, bound2)

    # KernelAggregation params (kaiming-uniform-scale weights, small biases)
    fan_in = (C // groups) * kernel_size * kernel_size
    wbound = math.sqrt(6.0 / fan_in)
    agg_w = jax.random.uniform(
        keys[5], (num_kernels, C, C // groups, kernel_size, kernel_size),
        jnp.float32, -wbound, wbound)
    agg_b = 0.1 * jax.random.normal(keys[6], (num_kernels, C), dtype=jnp.float32)

    params = dict(att_w1=w1, att_b1=b1, att_w2=w2, att_b2=b2,
                  agg_weight=agg_w, agg_bias=agg_b)

    att_ref, out_ref = _dyconv_reference(x, params, kernel_size=kernel_size,
                                         groups=groups)

    # attention kernel: single spatial block, and forced multi-tile streaming
    att_single = jax.block_until_ready(kernel_attention(x, w1, b1, w2, b2))
    att_tiled = jax.block_until_ready(
        kernel_attention(x, w1, b1, w2, b2, max_spatial_tile=128))
    assert att_single.shape == (B, num_kernels), att_single.shape
    assert jnp.allclose(att_single, att_ref, atol=1e-5, rtol=1e-5)
    assert jnp.allclose(att_tiled, att_ref, atol=1e-5, rtol=1e-5)

    # full DyConv forward, f32, tiled spatial axis (2 tiles -> halo path)
    out_f32_tiled = jax.block_until_ready(
        dyconv_forward(x, params, kernel_size=kernel_size, groups=groups,
                       compute_dtype=jnp.float32,
                       attention_spatial_tile=128, agg_hw_tile=256))
    assert out_f32_tiled.shape == (B, C, H, W), out_f32_tiled.shape
    assert jnp.allclose(out_f32_tiled, out_ref, atol=5e-3, rtol=5e-3)

    # full DyConv forward, f32, auto tile (single-tile path)
    out_f32_auto = jax.block_until_ready(
        dyconv_forward(x, params, kernel_size=kernel_size, groups=groups,
                       compute_dtype=jnp.float32))
    assert jnp.allclose(out_f32_auto, out_ref, atol=5e-3, rtol=5e-3)

    # full DyConv forward, bf16 streamed activations / weights, f32 accumulation
    out_bf16 = jax.block_until_ready(
        dyconv_forward(x, params, kernel_size=kernel_size, groups=groups,
                       compute_dtype=jnp.bfloat16, agg_hw_tile=256))
    assert jnp.allclose(out_bf16, out_ref, atol=5e-2, rtol=5e-2)

    print("KERNEL_OK")
</pallas_src>

<mosaic_0001>
module attributes {stable_mosaic.version = 11 : i64} {
  func.func @_attention_kernel(%arg0: i32, %arg1: i32, %arg2: memref<2x32x256xf32, #tpu.memory_space<vmem>>, %arg3: memref<32x4xf32, #tpu.memory_space<vmem>>, %arg4: memref<1x4xf32, #tpu.memory_space<vmem>>, %arg5: memref<4x4xf32, #tpu.memory_space<vmem>>, %arg6: memref<1x4xf32, #tpu.memory_space<vmem>>, %arg7: memref<2x4xf32, #tpu.memory_space<vmem>>, %arg8: memref<2x32x128xf32, #tpu.memory_space<vmem>>) attributes {dimension_semantics = [#tpu.dimension_semantics<parallel>, #tpu.dimension_semantics<arbitrary>], iteration_bounds = array<i64: 1, 1>, scalar_prefetch = 0 : i64, scratch_operands = 1 : i64, tpu.core_type = #tpu.core_type<tc>, window_params = [{transform_indices = @transform_0, window_bounds = array<i64: 2, 32, 256>}, {pipeline_mode = #tpu.pipeline_mode<synchronous>, transform_indices = @transform_1, window_bounds = array<i64: 32, 4>}, {pipeline_mode = #tpu.pipeline_mode<synchronous>, transform_indices = @transform_2, window_bounds = array<i64: 1, 4>}, {pipeline_mode = #tpu.pipeline_mode<synchronous>, transform_indices = @transform_3, window_bounds = array<i64: 4, 4>}, {pipeline_mode = #tpu.pipeline_mode<synchronous>, transform_indices = @transform_4, window_bounds = array<i64: 1, 4>}, {transform_indices = @transform_5, window_bounds = array<i64: 2, 4>}]} {
    %c0_i32 = arith.constant 0 : i32
    %0 = arith.cmpi eq, %arg1, %c0_i32 : i32
    %1 = arith.extui %0 : i1 to i32
    %c0_i32_0 = arith.constant 0 : i32
    %2 = arith.cmpi ne, %1, %c0_i32_0 : i32
    scf.if %2 {
      %cst = arith.constant 0.000000e+00 : f32
      %14 = vector.broadcast %cst : f32 to vector<2x32x128xf32>
      %c0_19 = arith.constant 0 : index
      %c0_20 = arith.constant 0 : index
      %c0_21 = arith.constant 0 : index
      %15 = vector.load %arg8[%c0_19, %c0_20, %c0_21] : memref<2x32x128xf32, #tpu.memory_space<vmem>>, vector<2x32x128xf32>
      tpu.vector_store %arg8[%c0_19, %c0_20, %c0_21], %14 {strides = array<i32>} : memref<2x32x128xf32, #tpu.memory_space<vmem>>, vector<2x32x128xf32>,
    } else {
    }
    %c0 = arith.constant 0 : index
    %c0_1 = arith.constant 0 : index
    %c0_2 = arith.constant 0 : index
    %3 = vector.load %arg8[%c0, %c0_1, %c0_2] : memref<2x32x128xf32, #tpu.memory_space<vmem>>, vector<2x32x128xf32>
    %c0_3 = arith.constant 0 : index
    %c0_4 = arith.constant 0 : index
    %c0_5 = arith.constant 0 : index
    %4 = vector.load %arg2[%c0_3, %c0_4, %c0_5] : memref<2x32x256xf32, #tpu.memory_space<vmem>>, vector<2x32x128xf32>
    %5 = arith.addf %3, %4 : vector<2x32x128xf32>
    %c0_6 = arith.constant 0 : index
    %c0_7 = arith.constant 0 : index
    %c0_8 = arith.constant 0 : index
    %6 = vector.load %arg8[%c0_6, %c0_7, %c0_8] : memref<2x32x128xf32, #tpu.memory_space<vmem>>, vector<2x32x128xf32>
    tpu.vector_store %arg8[%c0_6, %c0_7, %c0_8], %5 {strides = array<i32>} : memref<2x32x128xf32, #tpu.memory_space<vmem>>, vector<2x32x128xf32>,
    %c0_9 = arith.constant 0 : index
    %c0_10 = arith.constant 0 : index
    %c0_11 = arith.constant 0 : index
    %7 = vector.load %arg8[%c0_9, %c0_10, %c0_11] : memref<2x32x128xf32, #tpu.memory_space<vmem>>, vector<2x32x128xf32>
    %c0_12 = arith.constant 0 : index
    %c0_13 = arith.constant 0 : index
    %c128 = arith.constant 128 : index
    %8 = vector.load %arg2[%c0_12, %c0_13, %c128] : memref<2x32x256xf32, #tpu.memory_space<vmem>>, vector<2x32x128xf32>
    %9 = arith.addf %7, %8 : vector<2x32x128xf32>
    %c0_14 = arith.constant 0 : index
    %c0_15 = arith.constant 0 : index
    %c0_16 = arith.constant 0 : index
    %10 = vector.load %arg8[%c0_14, %c0_15, %c0_16] : memref<2x32x128xf32, #tpu.memory_space<vmem>>, vector<2x32x128xf32>
    tpu.vector_store %arg8[%c0_14, %c0_15, %c0_16], %9 {strides = array<i32>} : memref<2x32x128xf32, #tpu.memory_space<vmem>>, vector<2x32x128xf32>,
    %c0_i32_17 = arith.constant 0 : i32
    %11 = arith.cmpi eq, %arg1, %c0_i32_17 : i32
    %12 = arith.extui %11 : i1 to i32
    %c0_i32_18 = arith.constant 0 : i32
    %13 = arith.cmpi ne, %12, %c0_i32_18 : i32
    scf.if %13 {
      %c0_19 = arith.constant 0 : index
      %c0_20 = arith.constant 0 : index
      %c0_21 = arith.constant 0 : index
      %14 = vector.load %arg8[%c0_19, %c0_20, %c0_21] : memref<2x32x128xf32, #tpu.memory_space<vmem>>, vector<2x32x128xf32>
      %cst = arith.constant dense<0.000000e+00> : vector<2x32xf32>
      %15 = vector.multi_reduction <add>, %14, %cst [2] : vector<2x32x128xf32> to vector<2x32xf32>
      %cst_22 = arith.constant 3.906250e-03 : f32
      %16 = vector.broadcast %cst_22 : f32 to vector<2x32xf32>
      %17 = arith.mulf %15, %16 : vector<2x32xf32>
      %c0_23 = arith.constant 0 : index
      %c0_24 = arith.constant 0 : index
      %18 = vector.load %arg3[%c0_23, %c0_24] : memref<32x4xf32, #tpu.memory_space<vmem>>, vector<32x4xf32>
      %cst_25 = arith.constant dense<0.000000e+00> : vector<2x4xf32>
      %19 = tpu.matmul %17, %18, %cst_25 {dimension_numbers = #tpu.dot_dimension_numbers<[1], [0], [0], [1], [0, 0, 1, 1], [], []>} : vector<2x32xf32>, vector<32x4xf32>, vector<2x4xf32> -> vector<2x4xf32>
      %c0_26 = arith.constant 0 : index
      %c0_27 = arith.constant 0 : index
      %20 = vector.load %arg4[%c0_26, %c0_27] : memref<1x4xf32, #tpu.memory_space<vmem>>, vector<1x4xf32>
      %21 = vector.broadcast %20 : vector<1x4xf32> to vector<2x4xf32>
      %22 = arith.addf %19, %21 : vector<2x4xf32>
      %cst_28 = arith.constant 5.000000e-01 : f32
      %23 = vector.broadcast %cst_28 : f32 to vector<2x4xf32>
      %24 = arith.mulf %23, %22 : vector<2x4xf32>
      %cst_29 = arith.constant 0.707106769 : f32
      %25 = vector.broadcast %cst_29 : f32 to vector<2x4xf32>
      %26 = arith.mulf %22, %25 : vector<2x4xf32>
      %27 = math.erf %26 : vector<2x4xf32>
      %cst_30 = arith.constant 1.000000e+00 : f32
      %28 = vector.broadcast %cst_30 : f32 to vector<2x4xf32>
      %29 = arith.addf %28, %27 : vector<2x4xf32>
      %30 = arith.mulf %24, %29 : vector<2x4xf32>
      %c0_31 = arith.constant 0 : index
      %c0_32 = arith.constant 0 : index
      %31 = vector.load %arg5[%c0_31, %c0_32] : memref<4x4xf32, #tpu.memory_space<vmem>>, vector<4x4xf32>
      %cst_33 = arith.constant dense<0.000000e+00> : vector<2x4xf32>
      %32 = tpu.matmul %30, %31, %cst_33 {dimension_numbers = #tpu.dot_dimension_numbers<[1], [0], [0], [1], [0, 0, 1, 1], [], []>} : vector<2x4xf32>, vector<4x4xf32>, vector<2x4xf32> -> vector<2x4xf32>
      %c0_34 = arith.constant 0 : index
      %c0_35 = arith.constant 0 : index
      %33 = vector.load %arg6[%c0_34, %c0_35] : memref<1x4xf32, #tpu.memory_space<vmem>>, vector<1x4xf32>
      %34 = vector.broadcast %33 : vector<1x4xf32> to vector<2x4xf32>
      %35 = arith.addf %32, %34 : vector<2x4xf32>
      %36 = arith.negf %35 : vector<2x4xf32>
      %37 = math.exp %36 : vector<2x4xf32>
      %cst_36 = arith.constant 1.000000e+00 : f32
      %38 = vector.broadcast %cst_36 : f32 to vector<2x4xf32>
      %39 = arith.addf %38, %37 : vector<2x4xf32>
      %40 = arith.divf %38, %39 : vector<2x4xf32>
      %c0_37 = arith.constant 0 : index
      %c0_38 = arith.constant 0 : index
      %41 = vector.load %arg7[%c0_37, %c0_38] : memref<2x4xf32, #tpu.memory_space<vmem>>, vector<2x4xf32>
      tpu.vector_store %arg7[%c0_37, %c0_38], %40 {strides = array<i32>} : memref<2x4xf32, #tpu.memory_space<vmem>>, vector<2x4xf32>,
    } else {
    }
    return
  }
  func.func @transform_0(%arg0: i32, %arg1: i32) -> (i32, i32, i32) {
    %c0_i32 = arith.constant 0 : i32
    %c0_i32_0 = arith.constant 0 : i32
    return %arg0, %c0_i32, %arg1 : i32, i32, i32
  }
  func.func @transform_1(%arg0: i32, %arg1: i32) -> (i32, i32) {
    %c0_i32 = arith.constant 0 : i32
    %c0_i32_0 = arith.constant 0 : i32
    %c0_i32_1 = arith.constant 0 : i32
    return %c0_i32, %c0_i32_0 : i32, i32
  }
  func.func @transform_2(%arg0: i32, %arg1: i32) -> (i32, i32) {
    %c0_i32 = arith.constant 0 : i32
    %c0_i32_0 = arith.constant 0 : i32
    %c0_i32_1 = arith.constant 0 : i32
    return %c0_i32, %c0_i32_0 : i32, i32
  }
  func.func @transform_3(%arg0: i32, %arg1: i32) -> (i32, i32) {
    %c0_i32 = arith.constant 0 : i32
    %c0_i32_0 = arith.constant 0 : i32
    %c0_i32_1 = arith.constant 0 : i32
    return %c0_i32, %c0_i32_0 : i32, i32
  }
  func.func @transform_4(%arg0: i32, %arg1: i32) -> (i32, i32) {
    %c0_i32 = arith.constant 0 : i32
    %c0_i32_0 = arith.constant 0 : i32
    %c0_i32_1 = arith.constant 0 : i32
    return %c0_i32, %c0_i32_0 : i32, i32
  }
  func.func @transform_5(%arg0: i32, %arg1: i32) -> (i32, i32) {
    %c0_i32 = arith.constant 0 : i32
    %c0_i32_0 = arith.constant 0 : i32
    return %arg0, %c0_i32 : i32, i32
  }
}

</mosaic_0001>

<bundles_post_ra>
// kernel: tpu_custom_call.1
= control target key start
LH: loop header
LB: loop body
LE: loop exit
PB: predicated region body
PF: predicated region fallthrough
CT: control target
= control target key end

     0   :  { %10 = vsyncpa [#allocation4], 0  ;;  %s578_s0 = inlined_call_operand.hbm [shape: f32[2,32,256], index: 0, kind: input, shape index: {}]   ;;  %s579_s1 = inlined_call_operand.vmem [shape: f32[32,4], index: 1, kind: input, shape index: {}]   ;;  %s580_s2 = inlined_call_operand.vmem [shape: f32[1,4], index: 2, kind: input, shape index: {}]   ;;  %s581_s3 = inlined_call_operand.vmem [shape: f32[4,4], index: 3, kind: input, shape index: {}]   ;;  %s582_s4 = inlined_call_operand.vmem [shape: f32[1,4], index: 4, kind: input, shape index: {}]   ;;  %s583_s5 = inlined_call_operand.hbm [shape: f32[2,4], index: 5, kind: output, shape index: {}]  }
   0x1   :  { %11 = vsyncpa [#allocation5], 0  ;;  %s496_s18 = smov [#allocation3]   ;;  %s448_s22 = scalar_lea.hbm %s578_s0, 2048 }
   0x2   :  { %s17_s19 = sshll.u32 %s496_s18, 4  ;;  %p449_p0 = scmp.ne.s32.totalorder %s578_s0, %s448_s22  ;;  %s18_s19 = int_to_ptr.vmem [resolvable:$true] %s17_s19 }
   0x3   :  { %p452_p1 = scmp.lt.u32.totalorder %s448_s22, %s578_s0 }
   0x5   :  { %p454_p2 = pnand %p452_p1, %p449_p0 }
   0x7   :  { %457 = shalt.err (!%p454_p2)
}
   0x8   :  { %s458_s27 = scalar_lea.vmem %s18_s19, 2048  ;;  %p463_p4 = scmp.lt.s32.totalorder %s18_s19, %s18_s19 }
   0x9   :  { %p459_p3 = scmp.ne.s32.totalorder %s18_s19, %s458_s27  ;;  %p464_p5 = scmp.lt.s32.totalorder %s458_s27, %s458_s27 }
   0xb   :  { %p465_p6 = por %p464_p5, %p463_p4 }
   0xd   :  { %p466_p7 = pnand %p465_p6, %p459_p3 }
   0xf   :  { %469 = shalt.err (!%p466_p7)
}
  0x10   :  { %s497_s28 = smov 256   ;;  %s498_s29 = smov 16  }
  0x11   :  { %23 = dma.hbm_to_vmem [thread:$0]  %s578_s0, 2048, %s18_s19, [#allocation4], %s497_s28, %s497_s28, %s498_s29  }
  0x12   :  { %492 = dma.done.wait [#allocation4], 2048  }
  0x13   :  { %493 = vsyncadd [#allocation4], 4294965248  ;;  %v59_v0 = vld [vmem:[#allocation3 + $0x40] sm:$0xff]  ;;  %v91_v1 = vld [vmem:[#allocation3 + $0x48] sm:$0xff]  ;;  %v499_v27 = vmov 0.0|0.0   ;;  %vm500_vm0 = vmmov 0   ;;  %v165_v32 = vlaneseq }
  0x14   :  { %v55_v2 = vld [vmem:[#allocation3] sm:$0xff]  ;;  %v99_v3 = vadd.f32 %v91_v1, %v59_v0  ;;  %v87_v4 = vld [vmem:[#allocation3 + $0x8] sm:$0xff]  ;;  %v60_v5 = vld [vmem:[#allocation3 + $0x50] sm:$0xff]  ;;  %429 = vmatprep.subr.bf16.mxu0 %v499_v27  ;;  %v501_v31 = vmov 0.0   ;;  %vm176_vm1 = vcmask 130112   ;;  %vm183_vm2 = vcmask 195712  }
  0x15   :  { %v92_v6 = vld [vmem:[#allocation3 + $0x58] sm:$0xff]  ;;  %v95_v7 = vadd.f32 %v87_v4, %v55_v2  ;;  %v56_v8 = vld [vmem:[#allocation3 + $0x10] sm:$0xff]  ;;  %v61_v12 = vld [vmem:[#allocation3 + $0x60] sm:$0xff]  ;;  %421 = vmatprep.mubr.msk.f32.mxu0 %vm500_vm0, %v501_v31  ;;  %424 = vmatprep.subr.mxu1 %v501_v31  ;;  %v166_v34 = vand.u32 127, %v165_v32  ;;  %v168_v39 = vshrl.u32 %v165_v32, 7  ;;  %vm190_vm3 = vcmask 261312  }
  0x16   :  { %v88_v9 = vld [vmem:[#allocation3 + $0x18] sm:$0xff]  ;;  %130 = vadd.xlane.f32.xlu1 %v99_v3  ;;  %v100_v10 = vadd.f32 %v92_v6, %v60_v5  ;;  %v93_v13 = vld [vmem:[#allocation3 + $0x68] sm:$0xff]  ;;  %v57_v14 = vld [vmem:[#allocation3 + $0x20] sm:$0xff]  ;;  %426 = vmatprep.mubr.msk.f32.mxu1 %vm500_vm0, %v501_v31  ;;  %vm211_vm4 = vcmask 1041409   ;;  %vm213_vm5 = vcmask 261120   ;;  %vm303_vm6 = vcmask 1043456  }
  0x17   :  { %122 = vadd.xlane.f32.xlu0 %v95_v7  ;;  %v96_v11 = vadd.f32 %v88_v9, %v56_v8  ;;  %v89_v15 = vld [vmem:[#allocation3 + $0x28] sm:$0xff]  ;;  %v101_v16 = vadd.f32 %v93_v13, %v61_v12  ;;  %v62_v18 = vld [vmem:[#allocation3 + $0x70] sm:$0xff]  ;;  %v94_v19 = vld [vmem:[#allocation3 + $0x78] sm:$0xff]  ;;  %v171_v36 = vadd.s32 4294967288, %v166_v34  ;;  %v178_v38 = vadd.s32 4294967280, %v166_v34 }
  0x18   :  { %v97_v17 = vadd.f32 %v89_v15, %v57_v14  ;;  %v58_v20 = vld [vmem:[#allocation3 + $0x30] sm:$0xff]  ;;  %v90_v21 = vld [vmem:[#allocation3 + $0x38] sm:$0xff]  ;;  %v102_v22 = vadd.f32 %v94_v19, %v62_v18  ;;  %v146_v24 = vld [vmem:[%s579_s1] sm:$0xff]  ;;  %v185_v43 = vadd.s32 4294967272, %v166_v34  ;;  %v169_v47 = vsub.s32 %v166_v34, %v168_v39 }
  0x19   :  { %v98_v23 = vadd.f32 %v90_v21, %v58_v20  ;;  %v147_v25 = vld [vmem:[%s579_s1 + $0x8] sm:$0xff]  ;;  %v148_v28 = vld [vmem:[%s579_s1 + $0x10] sm:$0xff]  ;;  %v149_v29 = vld [vmem:[%s579_s1 + $0x18] sm:$0xff]  ;;  %v174_v41 = vsub.s32 %v171_v36, %v168_v39  ;;  %v181_v45 = vsub.s32 %v178_v38, %v168_v39  ;;  %vm299_vm7 = vcmask 31744  }
  0x1a   :  { %132 = vadd.xlane.f32.xlu1 %v100_v10  ;;  %v430_v26 = vpack.c.bf16 %v147_v25, %v146_v24  ;;  %v433_v30 = vpack.c.bf16 %v149_v29, %v148_v28  ;;  %v188_v54 = vsub.s32 %v185_v43, %v168_v39  ;;  %v291_v9 = vld [vmem:[%s581_s3] sm:$0xf]  ;;  %vm383_vm8 = vcmask 25600  }
  0x1b   :  { %124 = vadd.xlane.f32.xlu0 %v96_v11  ;;  %425 = vmatpush3.msk.msra.mxu1 %vm303_vm6, %v291_v9  ;;  %v400_v10 = vld [vmem:[%s580_s2] ss:$0 sm:$0xff]  ;;  %s502_s2 = smov [#allocation6]  }
  0x1c   :  { %431 = vmatpush3.bf16.msra.mxu0 %v430_v26  ;;  %v402_v19 = vld [vmem:[%s582_s4] ss:$0 sm:$0xff]  ;;  %s391_s3 = sshll.u32 %s502_s2, 4  ;;  %s392_s3 = int_to_ptr.vmem [resolvable:$true] %s391_s3 }
  0x1d   :  { %432 = vmatprep.subr.bf16.mxu0 %v499_v27  ;;  %s470_s19 = scalar_lea.vmem %s392_s3, 32  ;;  %p475_p9 = scmp.lt.s32.totalorder %s392_s3, %s392_s3 }
  0x1e   :  { %134 = vadd.xlane.f32.xlu1 %v101_v16  ;;  %p471_p8 = scmp.ne.s32.totalorder %s392_s3, %s470_s19  ;;  %p476_p10 = scmp.lt.s32.totalorder %s470_s19, %s470_s19 }
  0x1f   :  { %126 = vadd.xlane.f32.xlu0 %v97_v17 }
  0x20   :  { %434 = vmatpush3.bf16.msra.mxu0 %v433_v30  ;;  %p477_p11 = por %p476_p10, %p475_p9 }
  0x22   :  { %136 = vadd.xlane.f32.xlu1 %v102_v22  ;;  %p478_p12 = pnand %p477_p11, %p471_p8 }
  0x23   :  { %128 = vadd.xlane.f32.xlu0 %v98_v23 }
  0xa3   :  { %v131_v33 = vpop.xlane.xlu1 %130 }
  0xa4   :  { %v123_v35 = vpop.xlane.xlu0 %122  ;;  %v142_v48 = vmul.f32 0.00390625, %v131_v33 }
  0xa5   :  { %v138_v51 = vmul.f32 0.00390625, %v123_v35 }
  0xa6   :  { %v195_v58 = vrot.slane %v142_v48, %v169_v47 }
  0xa7   :  { %v133_v37 = vpop.xlane.xlu1 %132  ;;  %v170_v62 = vrot.slane %v138_v51, %v169_v47 }
  0xa8   :  { %v125_v40 = vpop.xlane.xlu0 %124  ;;  %v143_v42 = vmul.f32 0.00390625, %v133_v37 }
  0xa9   :  { %v139_v44 = vmul.f32 0.00390625, %v125_v40 }
  0xaa   :  { %v199_v53 = vrot.slane %v143_v42, %v174_v41 }
  0xab   :  { %v135_v46 = vpop.xlane.xlu1 %134  ;;  %v175_v55 = vrot.slane %v139_v44, %v174_v41 }
  0xac   :  { %v144_v49 = vmul.f32 0.00390625, %v135_v46  ;;  %v127_v50 = vpop.xlane.xlu0 %126  ;;  %v200_v0 = vsel %vm176_vm1, %v199_v53, %v195_v58 }
  0xad   :  { %v140_v52 = vmul.f32 0.00390625, %v127_v50  ;;  %v177_v2 = vsel %vm176_vm1, %v175_v55, %v170_v62 }
  0xae   :  { %v204_v56 = vrot.slane %v144_v49, %v181_v45 }
  0xaf   :  { %v137_v57 = vpop.xlane.xlu1 %136  ;;  %v182_v59 = vrot.slane %v140_v52, %v181_v45 }
  0xb0   :  { %v145_v60 = vmul.f32 0.00390625, %v137_v57  ;;  %v129_v61 = vpop.xlane.xlu0 %128  ;;  %v205_v3 = vsel %vm183_vm2, %v204_v56, %v200_v0 }
  0xb1   :  { %v141_v63 = vmul.f32 0.00390625, %v129_v61  ;;  %v184_v5 = vsel %vm183_vm2, %v182_v59, %v177_v2 }
  0xb2   :  { %v209_v1 = vrot.slane %v145_v60, %v188_v54 }
  0xb3   :  { %v189_v4 = vrot.slane %v141_v63, %v188_v54 }
  0xb4   :  { %v210_v6 = vsel %vm190_vm3, %v209_v1, %v205_v3 }
  0xb5   :  { %v191_v7 = vsel %vm190_vm3, %v189_v4, %v184_v5 }
  0xb6   :  { %v212_v8 = vsel %vm211_vm4, %v210_v6, %v191_v7 }
  0xb7   :  { %422 = vmatmul.mubr.msk.f32.vlgmr.msra.gmra.mrb[0].mxu0 %vm213_vm5, %v212_v8 }
 0x18a   :  { %v282_v11 = vpop.f32.mrb[0].mxu0 }
 0x18b   :  { %v283_v12 = vadd.f32 %v400_v10, %v282_v11  ;;  %v423_v13 = vpop.f32.mrb[1].mxu0 }
 0x18d   :  { %v287_v14 = vmul.f32 0.70710677, %v283_v12  ;;  %v286_v16 = vmul.f32 0.5, %v283_v12 }
 0x18f   :  { %442 = verf.f32 %v287_v14 }
 0x199   :  { %v443_v15 = vpop.eup %442 }
 0x19a   :  { %v289_v17 = vadd.f32 1.0, %v443_v15 }
 0x19c   :  { %v290_v18 = vmul.f32 %v289_v17, %v286_v16 }
 0x19e   :  { %427 = vmatmul.mubr.msk.f32.vlgmr.msra.gmra.mrb[0].mxu1 %vm299_vm7, %v290_v18 }
 0x271   :  { %v373_v20 = vpop.f32.mrb[0].mxu1 }
 0x272   :  { %v374_v21 = vadd.f32 %v402_v19, %v373_v20  ;;  %v428_v22 = vpop.f32.mrb[1].mxu1 }
 0x274   :  { %v405_v23 = vmul.f32 -1.442695, %v374_v21 }
 0x276   :  { %444 = vpow2.f32 %v405_v23 }
 0x280   :  { %v445_v24 = vpop.eup %444 }
 0x281   :  { %v380_v25 = vadd.f32 1.0, %v445_v24 }
 0x283   :  { %446 = vrcp.f32 %v380_v25 }
 0x28d   :  { %v447_v26 = vpop.eup %446 }
 0x28e   :  { %384 = vst.msk [vmem:[#allocation6] sm:$0x3] %vm383_vm8, %v447_v26 }
 0x28f   :  { %481 = shalt.err (!%p478_p12)
}
 0x290   :  { %s482_s21 = scalar_lea.hbm %s583_s5, 32 }
 0x291   :  { %p483_p13 = scmp.ne.s32.totalorder %s583_s5, %s482_s21  ;;  %p486_p0 = scmp.lt.u32.totalorder %s482_s21, %s583_s5 }
 0x293   :  { %p488_p1 = pnand %p486_p0, %p483_p13 }
 0x295   :  { %491 = shalt.err (!%p488_p1)
}
 0x296   :  { %394 = dma.vmem_to_hbm [thread:$0]  %s392_s3, 32, %s583_s5, [#allocation5]  }
 0x297   :  { %494 = dma.done.wait [#allocation5], 32  }
 0x298   :  { %495 = vsyncadd [#allocation5], 4294967264 }
 0x299   :  { %398 = vsyncpa [#allocation4], 1 }
 0x29a   :  { %399 = vsyncpa [#allocation5], 1 }

</bundles_post_ra>
